<compile_context>
chip_gen: v7x
topology: tpu7x:2x2x1
jax: 0.10.0
libtpu: 0.0.40
codegen_flags: <defaults>
</compile_context>

<pallas_src>
import functools

import jax
import jax.numpy as jnp
from jax.experimental import pallas as pl
from jax.experimental.pallas import tpu as pltpu

KERNEL_SIZES = (2, 3, 4)
NUM_BRANCHES = len(KERNEL_SIZES)
NEG = -1e30          # sentinel driving padded max-pool positions to "-inf"


def surname_kernel(x_ref, wall_ref, fcw_ref, fcb_ref, o_ref, *, cout):
    # x_ref   : (TB, S*Cin + 1)            flattened input + constant-1 column
    # wall_ref: (S*Cin + 1, NB*Lpad*cout)  block-Toeplitz conv weight (+bias row)
    # fcw_ref : (NB*Lpad*cout, c_pad)      position-replicated, /Lpad-scaled FC weight
    # fcb_ref : (1, c_pad)                 FC bias
    branch_cols = wall_ref.shape[1] // NUM_BRANCHES            # Lpad * cout (=128)

    # One MXU matmul emits every (branch, position, channel) pre-activation,
    # conv bias included; padded positions carry -1e30.
    p = jnp.dot(x_ref[...], wall_ref[...],
                preferred_element_type=jnp.float32)             # (TB, NB*128)

    pooled = []
    for bi in range(NUM_BRANCHES):
        m = p[:, bi * branch_cols:(bi + 1) * branch_cols]       # whole-vreg slice
        # Global max-pool over positions as a log2 tree of XLU lane rotations:
        # afterwards every lane holds the max of its channel (lane mod cout).
        shift = cout
        while shift < branch_cols:
            m = jnp.maximum(m, pltpu.roll(m, shift=shift, axis=1))
            shift *= 2
        pooled.append(jnp.maximum(m, 0.0))                      # ReLU
    z = jnp.concatenate(pooled, axis=1)                         # (TB, NB*128)

    # dropout is identity in eval/inference mode; single fused FC matmul.
    y = fcb_ref[...] + jnp.dot(z.astype(fcw_ref.dtype), fcw_ref[...],
                               preferred_element_type=jnp.float32)
    o_ref[...] = y


def _pack_conv_toeplitz(params, S, cin, cout, l_pad, dtype):
    """(S*Cin+1, NB*l_pad*cout) weight so one matmul yields all conv pre-acts."""
    branches = []
    for f in KERNEL_SIZES:
        w_f = params[f'w{f}']                                   # (f, Cin, Cout)
        b_f = params[f'b{f}']                                   # (1, Cout)
        L = S - f + 1                                           # 'valid' conv length
        cols = []
        for l in range(l_pad):
            blk = jnp.zeros((S * cin, cout), jnp.float32)
            if l < L:
                for k in range(f):
                    blk = blk.at[(l + k) * cin:(l + k + 1) * cin, :].set(w_f[k])
                bias_row = b_f                                  # real position: +bias
            else:
                bias_row = jnp.full((1, cout), NEG, jnp.float32)  # pad: -inf sentinel
            cols.append(jnp.concatenate([blk, bias_row], axis=0))
        branches.append(jnp.concatenate(cols, axis=1))
    return jnp.concatenate(branches, axis=1).astype(dtype)


def _pack_fc(params, cout, l_pad, c_pad, dtype):
    """Position-replicated FC weight so the fused (TB, NB*128) dot equals
    concat(pooled) @ fc_w (each branch block tiled l_pad times and /l_pad)."""
    num_classes = params['fc_w'].shape[1]
    blocks = []
    for bi in range(NUM_BRANCHES):
        blk = params['fc_w'][bi * cout:(bi + 1) * cout, :]      # (cout, classes)
        blocks.append(jnp.tile(blk, (l_pad, 1)) / l_pad)
    fc_w = jnp.concatenate(blocks, axis=0)                      # (NB*l_pad*cout, nc)
    fc_w = jnp.pad(fc_w, ((0, 0), (0, c_pad - num_classes)))
    fc_b = jnp.pad(params['fc_b'], ((0, 0), (0, c_pad - num_classes)))
    return fc_w.astype(dtype), fc_b                             # bias stays f32


def surname_forward(x, params, *, num_steps=1, dtype=jnp.float32):
    """x: (B, S, C_in) float32 -> logits (B, num_classes) float32.

    num_steps: grid steps over the batch.  Use 1 on single-TensorCore chips
      (v5e / v6e); 2 on v7x so each of its two TensorCores runs one step.
    dtype: matmul input dtype (jnp.bfloat16 recommended on v5e's bf16 MXU).
    """
    B, S, cin = x.shape
    cout = params['b2'].shape[1]
    num_classes = params['fc_w'].shape[1]
    c_pad = pl.cdiv(num_classes, 128) * 128                     # lane-dense output

    # Positions-per-branch padded so each branch block is lane-aligned (multiple
    # of 128 columns) and a power of two (for the roll/max reduction tree).
    l_max = S - min(KERNEL_SIZES) + 1
    l_pad = pl.next_power_of_2(l_max)
    while (l_pad * cout) % 128 != 0:
        l_pad *= 2

    # Whole (padded) batch in `num_steps` grid steps: per-step fixed cost
    # dominates this tiny workload, so keep steps minimal.
    quantum = 8 * num_steps
    b_pad = pl.cdiv(B, quantum) * quantum
    if b_pad != B:
        x = jnp.pad(x, ((0, b_pad - B), (0, 0), (0, 0)))
    tb = b_pad // num_steps

    # Flattened input + constant-1 column (carries conv bias / pad sentinel).
    x2d = jnp.concatenate(
        [x.reshape(b_pad, S * cin), jnp.ones((b_pad, 1), x.dtype)],
        axis=1).astype(dtype)                                   # (b_pad, S*Cin+1)

    w_all = _pack_conv_toeplitz(params, S, cin, cout, l_pad, dtype)
    fc_w, fc_b = _pack_fc(params, cout, l_pad, c_pad, dtype)

    def full(a):                                                # whole small array in VMEM
        return pl.BlockSpec(a.shape, lambda i: (0,) * a.ndim)

    out = pl.pallas_call(
        functools.partial(surname_kernel, cout=cout),
        out_shape=jax.ShapeDtypeStruct((b_pad, c_pad), jnp.float32),
        grid=(num_steps,),
        in_specs=[
            pl.BlockSpec((tb, S * cin + 1), lambda i: (i, 0)),  # x tiled over batch
            full(w_all), full(fc_w), full(fc_b),
        ],
        out_specs=pl.BlockSpec((tb, c_pad), lambda i: (i, 0)),
        compiler_params=pltpu.CompilerParams(
            dimension_semantics=("parallel",)),
    )(x2d, w_all, fc_w, fc_b)

    return out[:B, :num_classes]


def init_params(key, cin, cout, num_classes):
    """Deterministic synthetic parameters (PyTorch-style uniform fan-in init)."""
    keys = jax.random.split(key, 8)
    params = {}
    for i, f in enumerate(KERNEL_SIZES):
        scale = 1.0 / (cin * f) ** 0.5
        # conv weight stored as (f, Cin, Cout) == transpose of torch (Cout, Cin, f)
        params[f'w{f}'] = jax.random.uniform(
            keys[2 * i], (f, cin, cout), jnp.float32, -scale, scale)
        params[f'b{f}'] = jax.random.uniform(
            keys[2 * i + 1], (1, cout), jnp.float32, -scale, scale)
    scale = 1.0 / (3 * cout) ** 0.5
    # fc weight stored as (3*Cout, num_classes) == transpose of torch Linear weight
    params['fc_w'] = jax.random.uniform(
        keys[6], (3 * cout, num_classes), jnp.float32, -scale, scale)
    params['fc_b'] = jax.random.uniform(
        keys[7], (1, num_classes), jnp.float32, -scale, scale)
    return params


def reference_forward(x, params):
    """Pure-JAX reference (same math as the PyTorch forward, eval mode)."""
    feats = []
    for f in KERNEL_SIZES:
        w, b = params[f'w{f}'], params[f'b{f}']
        L = x.shape[1] - f + 1
        acc = b + sum(jnp.einsum('blc,co->blo', x[:, k:k + L, :], w[k])
                      for k in range(f))
        feats.append(jnp.maximum(jnp.max(acc, axis=1), 0.0))
    z = jnp.concatenate(feats, axis=1)
    return z @ params['fc_w'] + params['fc_b']


if __name__ == "__main__":
    # Shapes from the module spec: batch 64, one-hot vocab 10 input channels,
    # sequence length 8, 16 conv channels, 18 classes.
    B, S, CIN, COUT, NUM_CLASSES = 64, 8, 10, 16, 18

    key = jax.random.PRNGKey(0)
    k_x, k_p = jax.random.split(key)
    x = jax.random.normal(k_x, (B, S, CIN), jnp.float32)        # (B, seq, C_in)
    params = init_params(k_p, CIN, COUT, NUM_CLASSES)

    y = jax.block_until_ready(surname_forward(x, params))                 # v5e/v6e: 1 step
    y2 = jax.block_until_ready(surname_forward(x, params, num_steps=2))   # v7x: 2 steps

    y_ref = reference_forward(x, params)
    assert y.shape == (B, NUM_CLASSES)
    assert jnp.allclose(y, y_ref, atol=1e-4, rtol=1e-4)
    assert jnp.allclose(y2, y_ref, atol=1e-4, rtol=1e-4)

    # TODO(synk): train-mode dropout (RNG mask) and the optional apply_softmax
    # branch are not implemented; inference/eval semantics only.
    print("KERNEL_OK")
</pallas_src>

<mosaic_0001>
module attributes {stable_mosaic.version = 11 : i64} {
  func.func @surname_kernel(%arg0: i32, %arg1: memref<64x81xf32, #tpu.memory_space<vmem>>, %arg2: memref<81x384xf32, #tpu.memory_space<vmem>>, %arg3: memref<384x128xf32, #tpu.memory_space<vmem>>, %arg4: memref<1x128xf32, #tpu.memory_space<vmem>>, %arg5: memref<64x128xf32, #tpu.memory_space<vmem>>) attributes {dimension_semantics = [#tpu.dimension_semantics<parallel>], iteration_bounds = array<i64: 1>, scalar_prefetch = 0 : i64, scratch_operands = 0 : i64, tpu.core_type = #tpu.core_type<tc>, window_params = [{transform_indices = @transform_0, window_bounds = array<i64: 64, 81>}, {pipeline_mode = #tpu.pipeline_mode<synchronous>, transform_indices = @transform_1, window_bounds = array<i64: 81, 384>}, {pipeline_mode = #tpu.pipeline_mode<synchronous>, transform_indices = @transform_2, window_bounds = array<i64: 384, 128>}, {pipeline_mode = #tpu.pipeline_mode<synchronous>, transform_indices = @transform_3, window_bounds = array<i64: 1, 128>}, {transform_indices = @transform_4, window_bounds = array<i64: 64, 128>}]} {
    %c0 = arith.constant 0 : index
    %c0_0 = arith.constant 0 : index
    %0 = vector.load %arg1[%c0, %c0_0] : memref<64x81xf32, #tpu.memory_space<vmem>>, vector<64x81xf32>
    %c0_1 = arith.constant 0 : index
    %c0_2 = arith.constant 0 : index
    %1 = vector.load %arg2[%c0_1, %c0_2] : memref<81x384xf32, #tpu.memory_space<vmem>>, vector<81x384xf32>
    %cst = arith.constant dense<0.000000e+00> : vector<64x384xf32>
    %2 = tpu.matmul %0, %1, %cst {dimension_numbers = #tpu.dot_dimension_numbers<[1], [0], [0], [1], [0, 0, 1, 1], [], []>} : vector<64x81xf32>, vector<81x384xf32>, vector<64x384xf32> -> vector<64x384xf32>
    %3 = vector.extract_strided_slice %2 {offsets = [0, 0], sizes = [64, 128], strides = [1, 1]} : vector<64x384xf32> to vector<64x128xf32>
    %c16_i32 = arith.constant 16 : i32
    %4 = tpu.dynamic_rotate %3 by %c16_i32 dim 1 : vector<64x128xf32>, i32 -> vector<64x128xf32>
    %5 = arith.maximumf %3, %4 : vector<64x128xf32>
    %c32_i32 = arith.constant 32 : i32
    %6 = tpu.dynamic_rotate %5 by %c32_i32 dim 1 : vector<64x128xf32>, i32 -> vector<64x128xf32>
    %7 = arith.maximumf %5, %6 : vector<64x128xf32>
    %c64_i32 = arith.constant 64 : i32
    %8 = tpu.dynamic_rotate %7 by %c64_i32 dim 1 : vector<64x128xf32>, i32 -> vector<64x128xf32>
    %9 = arith.maximumf %7, %8 : vector<64x128xf32>
    %cst_3 = arith.constant 0.000000e+00 : f32
    %10 = vector.broadcast %cst_3 : f32 to vector<64x128xf32>
    %11 = arith.maximumf %9, %10 : vector<64x128xf32>
    %12 = vector.extract_strided_slice %2 {offsets = [0, 128], sizes = [64, 128], strides = [1, 1]} : vector<64x384xf32> to vector<64x128xf32>
    %c16_i32_4 = arith.constant 16 : i32
    %13 = tpu.dynamic_rotate %12 by %c16_i32_4 dim 1 : vector<64x128xf32>, i32 -> vector<64x128xf32>
    %14 = arith.maximumf %12, %13 : vector<64x128xf32>
    %c32_i32_5 = arith.constant 32 : i32
    %15 = tpu.dynamic_rotate %14 by %c32_i32_5 dim 1 : vector<64x128xf32>, i32 -> vector<64x128xf32>
    %16 = arith.maximumf %14, %15 : vector<64x128xf32>
    %c64_i32_6 = arith.constant 64 : i32
    %17 = tpu.dynamic_rotate %16 by %c64_i32_6 dim 1 : vector<64x128xf32>, i32 -> vector<64x128xf32>
    %18 = arith.maximumf %16, %17 : vector<64x128xf32>
    %cst_7 = arith.constant 0.000000e+00 : f32
    %19 = vector.broadcast %cst_7 : f32 to vector<64x128xf32>
    %20 = arith.maximumf %18, %19 : vector<64x128xf32>
    %21 = vector.extract_strided_slice %2 {offsets = [0, 256], sizes = [64, 128], strides = [1, 1]} : vector<64x384xf32> to vector<64x128xf32>
    %c16_i32_8 = arith.constant 16 : i32
    %22 = tpu.dynamic_rotate %21 by %c16_i32_8 dim 1 : vector<64x128xf32>, i32 -> vector<64x128xf32>
    %23 = arith.maximumf %21, %22 : vector<64x128xf32>
    %c32_i32_9 = arith.constant 32 : i32
    %24 = tpu.dynamic_rotate %23 by %c32_i32_9 dim 1 : vector<64x128xf32>, i32 -> vector<64x128xf32>
    %25 = arith.maximumf %23, %24 : vector<64x128xf32>
    %c64_i32_10 = arith.constant 64 : i32
    %26 = tpu.dynamic_rotate %25 by %c64_i32_10 dim 1 : vector<64x128xf32>, i32 -> vector<64x128xf32>
    %27 = arith.maximumf %25, %26 : vector<64x128xf32>
    %cst_11 = arith.constant 0.000000e+00 : f32
    %28 = vector.broadcast %cst_11 : f32 to vector<64x128xf32>
    %29 = arith.maximumf %27, %28 : vector<64x128xf32>
    %30 = tpu.concatenate %11, %20, %29 in 1 : vector<64x128xf32>, vector<64x128xf32>, vector<64x128xf32> -> vector<64x384xf32>
    %c0_12 = arith.constant 0 : index
    %c0_13 = arith.constant 0 : index
    %31 = vector.load %arg4[%c0_12, %c0_13] : memref<1x128xf32, #tpu.memory_space<vmem>>, vector<1x128xf32>
    %c0_14 = arith.constant 0 : index
    %c0_15 = arith.constant 0 : index
    %32 = vector.load %arg3[%c0_14, %c0_15] : memref<384x128xf32, #tpu.memory_space<vmem>>, vector<384x128xf32>
    %cst_16 = arith.constant dense<0.000000e+00> : vector<64x128xf32>
    %33 = tpu.matmul %30, %32, %cst_16 {dimension_numbers = #tpu.dot_dimension_numbers<[1], [0], [0], [1], [0, 0, 1, 1], [], []>} : vector<64x384xf32>, vector<384x128xf32>, vector<64x128xf32> -> vector<64x128xf32>
    %34 = vector.broadcast %31 : vector<1x128xf32> to vector<64x128xf32>
    %35 = arith.addf %34, %33 : vector<64x128xf32>
    %c0_17 = arith.constant 0 : index
    %c0_18 = arith.constant 0 : index
    %36 = vector.load %arg5[%c0_17, %c0_18] : memref<64x128xf32, #tpu.memory_space<vmem>>, vector<64x128xf32>
    tpu.vector_store %arg5[%c0_17, %c0_18], %35 {strides = array<i32>} : memref<64x128xf32, #tpu.memory_space<vmem>>, vector<64x128xf32>,
    return
  }
  func.func @transform_0(%arg0: i32) -> (i32, i32) {
    %c0_i32 = arith.constant 0 : i32
    %c0_i32_0 = arith.constant 0 : i32
    return %arg0, %c0_i32 : i32, i32
  }
  func.func @transform_1(%arg0: i32) -> (i32, i32) {
    %c0_i32 = arith.constant 0 : i32
    %c0_i32_0 = arith.constant 0 : i32
    %c0_i32_1 = arith.constant 0 : i32
    return %c0_i32, %c0_i32_0 : i32, i32
  }
  func.func @transform_2(%arg0: i32) -> (i32, i32) {
    %c0_i32 = arith.constant 0 : i32
    %c0_i32_0 = arith.constant 0 : i32
    %c0_i32_1 = arith.constant 0 : i32
    return %c0_i32, %c0_i32_0 : i32, i32
  }
  func.func @transform_3(%arg0: i32) -> (i32, i32) {
    %c0_i32 = arith.constant 0 : i32
    %c0_i32_0 = arith.constant 0 : i32
    %c0_i32_1 = arith.constant 0 : i32
    return %c0_i32, %c0_i32_0 : i32, i32
  }
  func.func @transform_4(%arg0: i32) -> (i32, i32) {
    %c0_i32 = arith.constant 0 : i32
    %c0_i32_0 = arith.constant 0 : i32
    return %arg0, %c0_i32 : i32, i32
  }
}

</mosaic_0001>

<bundles_post_ra>
// kernel: tpu_custom_call.1
= control target key start
LH: loop header
LB: loop body
LE: loop exit
PB: predicated region body
PF: predicated region fallthrough
CT: control target
= control target key end

     0   :  { %9 = vsyncpa [#allocation3], 0  ;;  %s1888_s0 = inlined_call_operand.hbm [shape: f32[64,81], index: 0, kind: input, shape index: {}]   ;;  %s1889_s1 = inlined_call_operand.hbm [shape: f32[81,384], index: 1, kind: input, shape index: {}]   ;;  %s1890_s2 = inlined_call_operand.hbm [shape: f32[384,128], index: 2, kind: input, shape index: {}]   ;;  %s1891_s3 = inlined_call_operand.vmem [shape: f32[1,128], index: 3, kind: input, shape index: {}]   ;;  %s1892_s4 = inlined_call_operand.hbm [shape: f32[64,128], index: 4, kind: output, shape index: {}]  }
   0x1   :  { %10 = vsyncpa [#allocation6], 0 }
   0x2   :  { %11 = vsyncpa [#allocation4], 0  ;;  %s1479_s15 = smov [#allocation5]   ;;  %s1385_s19 = scalar_lea.hbm %s1889_s1, 4224 }
   0x3   :  { %s29_s16 = sshll.u32 %s1479_s15, 4  ;;  %p1386_p0 = scmp.ne.s32.totalorder %s1889_s1, %s1385_s19  ;;  %s30_s16 = int_to_ptr.vmem [resolvable:$true] %s29_s16 }
   0x4   :  { %p1389_p1 = scmp.lt.u32.totalorder %s1385_s19, %s1889_s1 }
   0x6   :  { %p1391_p2 = pnand %p1389_p1, %p1386_p0 }
   0x8   :  { %1394 = shalt.err (!%p1391_p2)
}
   0x9   :  { %s1395_s24 = scalar_lea.vmem %s30_s16, 4224  ;;  %p1400_p4 = scmp.lt.s32.totalorder %s30_s16, %s30_s16 }
   0xa   :  { %p1396_p3 = scmp.ne.s32.totalorder %s30_s16, %s1395_s24  ;;  %p1401_p5 = scmp.lt.s32.totalorder %s1395_s24, %s1395_s24 }
   0xc   :  { %p1402_p6 = por %p1401_p5, %p1400_p4 }
   0xe   :  { %p1403_p7 = pnand %p1402_p6, %p1396_p3 }
  0x10   :  { %1406 = shalt.err (!%p1403_p7)
}
  0x11   :  { %s1480_s25 = smov 384   ;;  %s1481_s26 = smov 24  }
  0x12   :  { %35 = dma.hbm_to_vmem [thread:$0]  %s1889_s1, 4224, %s30_s16, [#allocation6], %s1480_s25, %s1480_s25, %s1481_s26  }
  0x13   :  { %s1482_s29 = smov [#allocation2]   ;;  %s1407_s7 = scalar_lea.hbm %s1888_s0, 1024 }
  0x14   :  { %s17_s30 = sshll.u32 %s1482_s29, 4  ;;  %p1408_p8 = scmp.ne.s32.totalorder %s1888_s0, %s1407_s7  ;;  %s18_s30 = int_to_ptr.vmem [resolvable:$true] %s17_s30 }
  0x15   :  { %p1411_p9 = scmp.lt.u32.totalorder %s1407_s7, %s1888_s0 }
  0x17   :  { %p1413_p10 = pnand %p1411_p9, %p1408_p8 }
  0x19   :  { %1416 = shalt.err (!%p1413_p10)
}
  0x1a   :  { %s1417_s12 = scalar_lea.vmem %s18_s30, 1024  ;;  %p1422_p12 = scmp.lt.s32.totalorder %s18_s30, %s18_s30 }
  0x1b   :  { %p1418_p11 = scmp.ne.s32.totalorder %s18_s30, %s1417_s12  ;;  %p1423_p13 = scmp.lt.s32.totalorder %s1417_s12, %s1417_s12 }
  0x1d   :  { %p1424_p0 = por %p1423_p13, %p1422_p12 }
  0x1f   :  { %p1425_p1 = pnand %p1424_p0, %p1418_p11 }
  0x21   :  { %1428 = shalt.err (!%p1425_p1)
}
  0x22   :  { %s1483_s1 = smov 128   ;;  %s1484_s13 = smov 8  }
  0x23   :  { %23 = dma.hbm_to_vmem [thread:$0]  %s1888_s0, 1024, %s18_s30, [#allocation3], %s1483_s1, %s1483_s1, %s1484_s13  }
  0x24   :  { %s1485_s16 = smov [#allocation7]   ;;  %s1429_s20 = scalar_lea.hbm %s1890_s2, 6144 }
  0x25   :  { %s41_s17 = sshll.u32 %s1485_s16, 4  ;;  %p1430_p2 = scmp.ne.s32.totalorder %s1890_s2, %s1429_s20  ;;  %s42_s17 = int_to_ptr.vmem [resolvable:$true] %s41_s17 }
  0x26   :  { %p1433_p3 = scmp.lt.u32.totalorder %s1429_s20, %s1890_s2 }
  0x28   :  { %p1435_p4 = pnand %p1433_p3, %p1430_p2 }
  0x2a   :  { %1438 = shalt.err (!%p1435_p4)
}
  0x2b   :  { %s1439_s25 = scalar_lea.vmem %s42_s17, 6144  ;;  %p1444_p6 = scmp.lt.s32.totalorder %s42_s17, %s42_s17 }
  0x2c   :  { %p1440_p5 = scmp.ne.s32.totalorder %s42_s17, %s1439_s25  ;;  %p1445_p7 = scmp.lt.s32.totalorder %s1439_s25, %s1439_s25 }
  0x2e   :  { %p1446_p8 = por %p1445_p7, %p1444_p6 }
  0x30   :  { %p1447_p9 = pnand %p1446_p8, %p1440_p5 }
  0x32   :  { %1450 = shalt.err (!%p1447_p9)
}
  0x33   :  { %47 = dma.hbm_to_vmem [thread:$0]  %s1890_s2, 6144, %s42_s17, [#allocation6], %s1483_s1, %s1483_s1, %s1484_s13  }
  0x34   :  { %1473 = dma.done.wait [#allocation3], 1024  }
  0x35   :  { %1474 = vsyncadd [#allocation3], 4294966272 }
  0x36   :  { %1475 = dma.done.wait [#allocation6], 10368  }
  0x37   :  { %1476 = vsyncadd [#allocation6], 4294956928  ;;  %v1486_v0 = vmov 0.0   ;;  %v68_v1 = vld [vmem:[#allocation5 + $0x8] sm:$0xff]  ;;  %v71_v2 = vld [vmem:[#allocation5 + $0x20] sm:$0xff]  ;;  %vm100_vm0 = vcmask 662528  }
  0x38   :  { %199 = vmatprep.mubr.f32.mxu0 %v1486_v0  ;;  %v67_v3 = vld [vmem:[#allocation5] sm:$0xff]  ;;  %v1089_v4 = vpack.c.bf16 %v71_v2, %v68_v1  ;;  %v70_v5 = vld [vmem:[#allocation5 + $0x18] sm:$0xff]  ;;  %v77_v7 = vld [vmem:[#allocation5 + $0x50] sm:$0xff]  ;;  %vm125_vm1 = vcmask 1040384   ;;  %s1487_s2 = smov 16   ;;  %s1488_s27 = smov 32  }
  0x39   :  { %v74_v6 = vld [vmem:[#allocation5 + $0x38] sm:$0xff]  ;;  %v1091_v8 = vpack.c.bf16 %v70_v5, %v67_v3  ;;  %v73_v10 = vld [vmem:[#allocation5 + $0x30] sm:$0xff]  ;;  %v76_v11 = vld [vmem:[#allocation5 + $0x48] sm:$0xff]  ;;  %s1489_s28 = smov 64  }
  0x3a   :  { %v1093_v9 = vpack.c.bf16 %v77_v7, %v74_v6  ;;  %v80_v12 = vld [vmem:[#allocation5 + $0x68] sm:$0xff]  ;;  %1090 = vmatprep.subr.bf16.mxu0 %v1089_v4  ;;  %v83_v13 = vld [vmem:[#allocation5 + $0x80] sm:$0xff]  ;;  %v1095_v14 = vpack.c.bf16 %v76_v11, %v73_v10  ;;  %v82_v17 = vld [vmem:[#allocation5 + $0x78] sm:$0xff] }
  0x3b   :  { %1092 = vmatpush1.bf16.msra.mxu0 %v1091_v8  ;;  %v1097_v15 = vpack.c.bf16 %v83_v13, %v80_v12  ;;  %v79_v16 = vld [vmem:[#allocation5 + $0x60] sm:$0xff]  ;;  %v86_v18 = vld [vmem:[#allocation5 + $0x98] sm:$0xff]  ;;  %v89_v19 = vld [vmem:[#allocation5 + $0xb0] sm:$0xff] }
  0x3c   :  { %1094 = vmatprep.subr.bf16.mxu0 %v1093_v9  ;;  %v69_v20 = vld [vmem:[#allocation5 + $0x10] sm:$0xff]  ;;  %v72_v21 = vld [vmem:[#allocation5 + $0x28] sm:$0xff]  ;;  %v75_v23 = vld [vmem:[#allocation5 + $0x40] sm:$0xff]  ;;  %v1099_v24 = vpack.c.bf16 %v82_v17, %v79_v16  ;;  %v1101_v28 = vpack.c.bf16 %v89_v19, %v86_v18 }
  0x3d   :  { %v1109_v22 = vpack.c.bf16 %v72_v21, %v69_v20  ;;  %v85_v25 = vld [vmem:[#allocation5 + $0x90] sm:$0xff]  ;;  %v88_v26 = vld [vmem:[#allocation5 + $0xa8] sm:$0xff]  ;;  %v78_v27 = vld [vmem:[#allocation5 + $0x58] sm:$0xff] }
  0x3e   :  { %v1113_v29 = vpack.c.bf16 %v78_v27, %v75_v23  ;;  %v59_v30 = vld [vmem:[#allocation2] sm:$0xff]  ;;  %v81_v31 = vld [vmem:[#allocation5 + $0x70] sm:$0xff]  ;;  %v84_v32 = vld [vmem:[#allocation5 + $0x88] sm:$0xff]  ;;  %v1103_v36 = vpack.c.bf16 %v88_v26, %v85_v25 }
  0x3f   :  { %1096 = vmatpush1.bf16.msra.mxu0 %v1095_v14  ;;  %1110 = vmatprep.subr.bf16.mxu1 %v1109_v22  ;;  %v92_v33 = vld [vmem:[#allocation5 + $0xc8] sm:$0xff]  ;;  %v95_v34 = vld [vmem:[#allocation5 + $0xe0] sm:$0xff]  ;;  %v1117_v35 = vpack.c.bf16 %v84_v32, %v81_v31  ;;  %v90_v38 = vld [vmem:[#allocation5 + $0xb8] sm:$0xff] }
  0x40   :  { %1098 = vmatprep.subr.bf16.mxu0 %v1097_v15  ;;  %1112 = vmatpush3.bf16.msra.mxu1 %v1109_v22  ;;  %v87_v37 = vld [vmem:[#allocation5 + $0xa0] sm:$0xff]  ;;  %v1105_v39 = vpack.c.bf16 %v95_v34, %v92_v33  ;;  %v94_v41 = vld [vmem:[#allocation5 + $0xd8] sm:$0xff]  ;;  %v93_v44 = vld [vmem:[#allocation5 + $0xd0] sm:$0xff] }
  0x41   :  { %1033 = vmatprep.mubr.msk.f32.mxu1 %vm100_vm0, %v59_v30  ;;  %1114 = vmatprep.subr.bf16.mxu1 %v1113_v29  ;;  %v91_v40 = vld [vmem:[#allocation5 + $0xc0] sm:$0xff]  ;;  %v1121_v42 = vpack.c.bf16 %v90_v38, %v87_v37  ;;  %v96_v45 = vld [vmem:[#allocation5 + $0xe8] sm:$0xff]  ;;  %v98_v46 = vld [vmem:[#allocation5 + $0xf8] sm:$0x1] }
  0x42   :  { %v1107_v43 = vpack.c.bf16 %v94_v41, %v91_v40  ;;  %v1125_v47 = vpack.c.bf16 %v96_v45, %v93_v44  ;;  %v97_v48 = vld [vmem:[#allocation5 + $0xf0] sm:$0x1]  ;;  %v99_v49 = vld [vmem:[#allocation5 + $0x100] sm:$0x1]  ;;  %v60_v50 = vld [vmem:[#allocation2 + $0x8] sm:$0xff] }
  0x43   :  { %1100 = vmatpush1.bf16.msra.mxu0 %v1099_v24  ;;  %v61_v51 = vld [vmem:[#allocation2 + $0x10] sm:$0xff]  ;;  %v62_v52 = vld [vmem:[#allocation2 + $0x18] sm:$0xff]  ;;  %v63_v53 = vld [vmem:[#allocation2 + $0x20] sm:$0xff] }
  0x44   :  { %1102 = vmatprep.subr.bf16.mxu0 %v1101_v28  ;;  %1116 = vmatpush3.bf16.msra.mxu1 %v1113_v29  ;;  %v64_v54 = vld [vmem:[#allocation2 + $0x28] sm:$0xff]  ;;  %v65_v55 = vld [vmem:[#allocation2 + $0x30] sm:$0xff]  ;;  %v66_v56 = vld [vmem:[#allocation2 + $0x38] sm:$0xff] }
  0x45   :  { %1118 = vmatprep.subr.bf16.mxu1 %v1117_v35 }
  0x47   :  { %1104 = vmatpush1.bf16.msra.mxu0 %v1103_v36 }
  0x48   :  { %1106 = vmatprep.subr.bf16.mxu0 %v1105_v39  ;;  %1120 = vmatpush3.bf16.msra.mxu1 %v1117_v35 }
  0x49   :  { %1122 = vmatprep.subr.bf16.mxu1 %v1121_v42 }
  0x4b   :  { %1108 = vmatpush1.bf16.msra.mxu0 %v1107_v43 }
  0x4c   :  { %892 = vmatprep.subr.msk.mxu0 %vm125_vm1, %v98_v46  ;;  %1124 = vmatpush3.bf16.msra.mxu1 %v1121_v42 }
  0x4d   :  { %1126 = vmatprep.subr.bf16.mxu1 %v1125_v47 }
  0x4f   :  { %893 = vmatpush1.msk.msra.mxu0 %vm125_vm1, %v97_v48 }
  0x50   :  { %894 = vmatmul.mubr.msk.f32.vlgmr.msra.gmra.mrb[0].mxu0 %vm100_vm0, %v59_v30  ;;  %1128 = vmatpush3.bf16.msra.mxu1 %v1125_v47 }
  0x51   :  { %205 = vmatprep.mubr.f32.mxu0 %v1486_v0  ;;  %1031 = vmatprep.subr.msk.mxu1 %vm125_vm1, %v99_v49 }
  0x54   :  { %895 = vmatmul.mubr.msk.f32.gmra.mrb[2].mxu0 %vm100_vm0, %v60_v50  ;;  %1032 = vmatpush3.msk.msra.mxu1 %vm125_vm1, %v99_v49 }
  0x55   :  { %211 = vmatprep.mubr.f32.mxu0 %v1486_v0  ;;  %1034 = vmatmul.mubr.msk.f32.vlgmr.msra.gmra.mrb[0].mxu1 %vm100_vm0, %v60_v50 }
  0x56   :  { %1036 = vmatprep.mubr.msk.f32.mxu1 %vm100_vm0, %v61_v51 }
  0x58   :  { %896 = vmatmul.mubr.msk.f32.gmra.mrb[4].mxu0 %vm100_vm0, %v61_v51 }
  0x59   :  { %217 = vmatprep.mubr.f32.mxu0 %v1486_v0  ;;  %1037 = vmatmul.mubr.msk.f32.gmra.mrb[2].mxu1 %vm100_vm0, %v62_v52 }
  0x5a   :  { %1039 = vmatprep.mubr.msk.f32.mxu1 %vm100_vm0, %v63_v53 }
  0x5c   :  { %897 = vmatmul.mubr.msk.f32.gmra.mrb[6].mxu0 %vm100_vm0, %v62_v52 }
  0x5d   :  { %223 = vmatprep.mubr.f32.mxu0 %v1486_v0  ;;  %1040 = vmatmul.mubr.msk.f32.gmra.mrb[4].mxu1 %vm100_vm0, %v64_v54 }
  0x5e   :  { %1042 = vmatprep.mubr.msk.f32.mxu1 %vm100_vm0, %v65_v55 }
  0x60   :  { %898 = vmatmul.mubr.msk.f32.gmra.mrb[8].mxu0 %vm100_vm0, %v63_v53 }
  0x61   :  { %229 = vmatprep.mubr.f32.mxu0 %v1486_v0  ;;  %1043 = vmatmul.mubr.msk.f32.gmra.mrb[6].mxu1 %vm100_vm0, %v66_v56 }
  0x64   :  { %899 = vmatmul.mubr.msk.f32.gmra.mrb[10].mxu0 %vm100_vm0, %v64_v54 }
  0x65   :  { %235 = vmatprep.mubr.f32.mxu0 %v1486_v0 }
  0x68   :  { %900 = vmatmul.mubr.msk.f32.gmra.mrb[12].mxu0 %vm100_vm0, %v65_v55 }
  0x69   :  { %241 = vmatprep.mubr.f32.mxu0 %v1486_v0 }
  0x6c   :  { %901 = vmatmul.mubr.msk.f32.gmra.mrb[14].mxu0 %vm100_vm0, %v66_v56 }
 0x123   :  { %v201_v57 = vpop.f32.mrb[0].mxu0 }
 0x124   :  { %v203_v58 = vpop.f32.mrb[1].mxu0 }
 0x125   :  { %v1205_v59 = vpack.i.bf16 %v201_v57, %v203_v58 }
 0x127   :  { %1206 = vrot.lane.b32.xlu0 %v1205_v59, %s1487_s2  ;;  %v207_v60 = vpop.f32.mrb[2].mxu0 }
 0x128   :  { %v209_v61 = vpop.f32.mrb[3].mxu0  ;;  %v1587_v63 = vpop.f32.mrb[0].mxu1 }
 0x129   :  { %v1210_v62 = vpack.i.bf16 %v207_v60, %v209_v61  ;;  %v1589_v1 = vpop.f32.mrb[1].mxu1 }
 0x12a   :  { %v1225_v0 = vpack.i.bf16 %v1587_v63, %v1589_v1 }
 0x12b   :  { %1211 = vrot.lane.b32.xlu0 %v1210_v62, %s1487_s2  ;;  %v213_v2 = vpop.f32.mrb[4].mxu0 }
 0x12c   :  { %v215_v3 = vpop.f32.mrb[5].mxu0  ;;  %v1594_v5 = vpop.f32.mrb[2].mxu1 }
 0x12d   :  { %v1215_v4 = vpack.i.bf16 %v213_v2, %v215_v3  ;;  %v1596_v6 = vpop.f32.mrb[3].mxu1 }
 0x12e   :  { %v1230_v8 = vpack.i.bf16 %v1594_v5, %v1596_v6 }
 0x12f   :  { %1216 = vrot.lane.b32.xlu1 %v1215_v4, %s1487_s2  ;;  %v219_v7 = vpop.f32.mrb[6].mxu0 }
 0x130   :  { %v221_v9 = vpop.f32.mrb[7].mxu0  ;;  %v1601_v11 = vpop.f32.mrb[4].mxu1 }
 0x131   :  { %v1220_v10 = vpack.i.bf16 %v219_v7, %v221_v9  ;;  %v1603_v12 = vpop.f32.mrb[5].mxu1 }
 0x132   :  { %v1235_v14 = vpack.i.bf16 %v1601_v11, %v1603_v12 }
 0x133   :  { %1221 = vrot.lane.b32.xlu1 %v1220_v10, %s1487_s2  ;;  %v225_v13 = vpop.f32.mrb[8].mxu0 }
 0x134   :  { %v227_v15 = vpop.f32.mrb[9].mxu0  ;;  %v1608_v17 = vpop.f32.mrb[6].mxu1 }
 0x135   :  { %v1240_v16 = vpack.i.bf16 %v225_v13, %v227_v15  ;;  %v1610_v18 = vpop.f32.mrb[7].mxu1 }
 0x136   :  { %v1260_v20 = vpack.i.bf16 %v1608_v17, %v1610_v18 }
 0x137   :  { %1226 = vrot.lane.b32.xlu1 %v1225_v0, %s1487_s2  ;;  %1241 = vrot.lane.b32.xlu0 %v1240_v16, %s1487_s2  ;;  %v1614_v19 = vpop.f32.mrb[10].mxu0 }
 0x138   :  { %v1618_v21 = vpop.f32.mrb[11].mxu0 }
 0x139   :  { %v1245_v22 = vpack.i.bf16 %v1614_v19, %v1618_v21 }
 0x13b   :  { %1231 = vrot.lane.b32.xlu1 %v1230_v8, %s1487_s2  ;;  %1246 = vrot.lane.b32.xlu0 %v1245_v22, %s1487_s2  ;;  %v1624_v23 = vpop.f32.mrb[12].mxu0 }
 0x13c   :  { %v1626_v24 = vpop.f32.mrb[13].mxu0 }
 0x13d   :  { %v1250_v25 = vpack.i.bf16 %v1624_v23, %v1626_v24 }
 0x13f   :  { %1236 = vrot.lane.b32.xlu1 %v1235_v14, %s1487_s2  ;;  %1251 = vrot.lane.b32.xlu0 %v1250_v25, %s1487_s2  ;;  %v1632_v26 = vpop.f32.mrb[14].mxu0 }
 0x140   :  { %v1634_v27 = vpop.f32.mrb[15].mxu0 }
 0x141   :  { %v1255_v28 = vpack.i.bf16 %v1632_v26, %v1634_v27 }
 0x143   :  { %1261 = vrot.lane.b32.xlu1 %v1260_v20, %s1487_s2  ;;  %1256 = vrot.lane.b32.xlu0 %v1255_v28, %s1487_s2 }
 0x199   :  { %v1207_v29 = vpop.permute.xlu0 %1206 }
 0x19a   :  { %v1209_v30 = vunpack.i.h.bf16 %v1207_v29  ;;  %v1208_v31 = vunpack.i.l.bf16 %v1207_v29 }
 0x19c   :  { %v1640_v32 = vmax.f32 %v201_v57, %v1209_v30  ;;  %v1642_v33 = vmax.f32 %v203_v58, %v1208_v31 }
 0x19d   :  { %v1212_v34 = vpop.permute.xlu0 %1211 }
 0x19e   :  { %v1214_v35 = vunpack.i.h.bf16 %v1212_v34  ;;  %v1213_v36 = vunpack.i.l.bf16 %v1212_v34  ;;  %v1265_v37 = vpack.i.bf16 %v1640_v32, %v1642_v33 }
 0x1a0   :  { %v1646_v38 = vmax.f32 %v207_v60, %v1214_v35  ;;  %v1648_v39 = vmax.f32 %v209_v61, %v1213_v36  ;;  %1266 = vrot.lane.b32.xlu0 %v1265_v37, %s1488_s27 }
 0x1a1   :  { %v1217_v40 = vpop.permute.xlu1 %1216 }
 0x1a2   :  { %v1219_v41 = vunpack.i.h.bf16 %v1217_v40  ;;  %v1218_v42 = vunpack.i.l.bf16 %v1217_v40  ;;  %v1270_v43 = vpack.i.bf16 %v1646_v38, %v1648_v39  ;;  %v610_v40 = vld [vmem:[#allocation7 + $0x80] sm:$0xff] }
 0x1a4   :  { %v1653_v44 = vmax.f32 %v213_v2, %v1219_v41  ;;  %v1655_v45 = vmax.f32 %v215_v3, %v1218_v42  ;;  %1271 = vrot.lane.b32.xlu1 %v1270_v43, %s1488_s27  ;;  %v611_v41 = vld [vmem:[#allocation7 + $0x88] sm:$0xff] }
 0x1a5   :  { %v1222_v46 = vpop.permute.xlu1 %1221 }
 0x1a6   :  { %v1224_v47 = vunpack.i.h.bf16 %v1222_v46  ;;  %v1223_v48 = vunpack.i.l.bf16 %v1222_v46  ;;  %v1275_v49 = vpack.i.bf16 %v1653_v44, %v1655_v45 }
 0x1a8   :  { %v1660_v50 = vmax.f32 %v219_v7, %v1224_v47  ;;  %v1662_v51 = vmax.f32 %v221_v9, %v1223_v48  ;;  %1276 = vrot.lane.b32.xlu0 %v1275_v49, %s1488_s27  ;;  %v595_v48 = vld [vmem:[#allocation7 + $0x8] sm:$0xff]  ;;  %v612_v49 = vld [vmem:[#allocation7 + $0x90] sm:$0xff] }
 0x1a9   :  { %v1227_v52 = vpop.permute.xlu1 %1226  ;;  %v1242_v53 = vpop.permute.xlu0 %1241 }
 0x1aa   :  { %v1229_v54 = vunpack.i.h.bf16 %v1227_v52  ;;  %v1228_v55 = vunpack.i.l.bf16 %v1227_v52  ;;  %v1244_v56 = vunpack.i.h.bf16 %v1242_v53  ;;  %v1243_v57 = vunpack.i.l.bf16 %v1242_v53  ;;  %v613_v52 = vld [vmem:[#allocation7 + $0x98] sm:$0xff] }
 0x1ab   :  { %v1280_v58 = vpack.i.bf16 %v1660_v50, %v1662_v51  ;;  %v1129_v53 = vpack.c.bf16 %v611_v41, %v610_v40  ;;  %v620_v40 = vld [vmem:[#allocation7 + $0xd0] sm:$0xff]  ;;  %v621_v41 = vld [vmem:[#allocation7 + $0xd8] sm:$0xff] }
 0x1ac   :  { %v1668_v59 = vmax.f32 %v1587_v63, %v1229_v54  ;;  %v1671_v60 = vmax.f32 %v1589_v1, %v1228_v55  ;;  %v1673_v61 = vmax.f32 %v225_v13, %v1244_v56  ;;  %v1675_v62 = vmax.f32 %v227_v15, %v1243_v57  ;;  %v597_v55 = vld [vmem:[#allocation7 + $0x18] sm:$0xff]  ;;  %v615_v57 = vld [vmem:[#allocation7 + $0xa8] sm:$0xff] }
 0x1ad   :  { %1281 = vrot.lane.b32.xlu1 %v1280_v58, %s1488_s27  ;;  %v1232_v2 = vpop.permute.xlu1 %1231  ;;  %v1247_v0 = vpop.permute.xlu0 %1246  ;;  %v1133_v56 = vpack.c.bf16 %v613_v52, %v612_v49  ;;  %1130 = vmatprep.subr.bf16.mxu0 %v1129_v53  ;;  %v604_v49 = vld [vmem:[#allocation7 + $0x50] sm:$0xff]  ;;  %v605_v52 = vld [vmem:[#allocation7 + $0x58] sm:$0xff]  ;;  %v622_v53 = vld [vmem:[#allocation7 + $0xe0] sm:$0xff] }
 0x1ae   :  { %v1234_v3 = vunpack.i.h.bf16 %v1232_v2  ;;  %v1233_v4 = vunpack.i.l.bf16 %v1232_v2  ;;  %v1249_v7 = vunpack.i.h.bf16 %v1247_v0  ;;  %v1248_v8 = vunpack.i.l.bf16 %v1247_v0  ;;  %v598_v0 = vld [vmem:[#allocation7 + $0x20] sm:$0xff] }
 0x1af   :  { %v1285_v9 = vpack.i.bf16 %v1668_v59, %v1671_v60  ;;  %v1300_v63 = vpack.i.bf16 %v1673_v61, %v1675_v62 }
 0x1b0   :  { %v1683_v1 = vmax.f32 %v1594_v5, %v1234_v3  ;;  %v1686_v10 = vmax.f32 %v1596_v6, %v1233_v4  ;;  %v1689_v13 = vmax.f32 %v1614_v19, %v1249_v7  ;;  %v1692_v14 = vmax.f32 %v1618_v21, %v1248_v8  ;;  %v599_v3 = vld [vmem:[#allocation7 + $0x28] sm:$0xff]  ;;  %v626_v4 = vld [vmem:[#allocation7 + $0x100] sm:$0xff]  ;;  %v616_v7 = vld [vmem:[#allocation7 + $0xb0] sm:$0xff] }
 0x1b1   :  { %1286 = vrot.lane.b32.xlu1 %v1285_v9, %s1488_s27  ;;  %1301 = vrot.lane.b32.xlu0 %v1300_v63, %s1488_s27  ;;  %v1237_v15 = vpop.permute.xlu1 %1236  ;;  %v1252_v16 = vpop.permute.xlu0 %1251  ;;  %v617_v8 = vld [vmem:[#allocation7 + $0xb8] sm:$0xff]  ;;  %v627_v9 = vld [vmem:[#allocation7 + $0x108] sm:$0xff] }
 0x1b2   :  { %v1239_v20 = vunpack.i.h.bf16 %v1237_v15  ;;  %v1238_v22 = vunpack.i.l.bf16 %v1237_v15  ;;  %v1254_v25 = vunpack.i.h.bf16 %v1252_v16  ;;  %v1253_v5 = vunpack.i.l.bf16 %v1252_v16  ;;  %v628_v15 = vld [vmem:[#allocation7 + $0x110] sm:$0xff] }
 0x1b3   :  { %v1290_v6 = vpack.i.bf16 %v1683_v1, %v1686_v10  ;;  %v1305_v19 = vpack.i.bf16 %v1689_v13, %v1692_v14  ;;  %v1161_v63 = vpack.c.bf16 %v627_v9, %v626_v4  ;;  %v1139_v16 = vpack.c.bf16 %v599_v3, %v598_v0  ;;  %v608_v0 = vld [vmem:[#allocation7 + $0x70] sm:$0xff]  ;;  %v609_v3 = vld [vmem:[#allocation7 + $0x78] sm:$0xff] }
 0x1b4   :  { %v1701_v28 = vmax.f32 %v1601_v11, %v1239_v20  ;;  %v1704_v21 = vmax.f32 %v1603_v12, %v1238_v22  ;;  %v1707_v29 = vmax.f32 %v1624_v23, %v1254_v25  ;;  %v1710_v30 = vmax.f32 %v1626_v24, %v1253_v5  ;;  %v594_v24 = vld [vmem:[#allocation7] sm:$0xff]  ;;  %v629_v20 = vld [vmem:[#allocation7 + $0x118] sm:$0xff]  ;;  %v600_v25 = vld [vmem:[#allocation7 + $0x30] sm:$0xff] }
 0x1b5   :  { %1291 = vrot.lane.b32.xlu1 %v1290_v6, %s1488_s27  ;;  %1306 = vrot.lane.b32.xlu0 %v1305_v19, %s1488_s27  ;;  %v1262_v31 = vpop.permute.xlu1 %1261  ;;  %v1257_v34 = vpop.permute.xlu0 %1256  ;;  %v1131_v54 = vpack.c.bf16 %v595_v48, %v594_v24  ;;  %v1141_v22 = vpack.c.bf16 %v617_v8, %v616_v7  ;;  %v601_v5 = vld [vmem:[#allocation7 + $0x38] sm:$0xff]  ;;  %v1165_v6 = vpack.c.bf16 %v629_v20, %v628_v15  ;;  %v630_v19 = vld [vmem:[#allocation7 + $0x120] sm:$0xff]  ;;  %v635_v15 = vld [vmem:[#allocation7 + $0x148] sm:$0xff] }
 0x1b6   :  { %v1264_v35 = vunpack.i.h.bf16 %v1262_v31  ;;  %v1263_v36 = vunpack.i.l.bf16 %v1262_v31  ;;  %v1259_v37 = vunpack.i.h.bf16 %v1257_v34  ;;  %v1258_v11 = vunpack.i.l.bf16 %v1257_v34  ;;  %1162 = vmatprep.subr.bf16.mxu1 %v1161_v63  ;;  %v618_v31 = vld [vmem:[#allocation7 + $0xc0] sm:$0xff]  ;;  %v619_v34 = vld [vmem:[#allocation7 + $0xc8] sm:$0xff]  ;;  %v633_v4 = vld [vmem:[#allocation7 + $0x138] sm:$0xff] }
 0x1b7   :  { %v1295_v12 = vpack.i.bf16 %v1701_v28, %v1704_v21  ;;  %v1310_v23 = vpack.i.bf16 %v1707_v29, %v1710_v30  ;;  %1132 = vmatpush3.bf16.msra.mxu0 %v1131_v54  ;;  %1164 = vmatpush3.bf16.msra.mxu1 %v1161_v63  ;;  %v1149_v48 = vpack.c.bf16 %v621_v41, %v620_v40  ;;  %v623_v54 = vld [vmem:[#allocation7 + $0xe8] sm:$0xff]  ;;  %v634_v63 = vld [vmem:[#allocation7 + $0x140] sm:$0xff] }
 0x1b8   :  { %v1719_v42 = vmax.f32 %v1608_v17, %v1264_v35  ;;  %v1722_v43 = vmax.f32 %v1610_v18, %v1263_v36  ;;  %v1725_v46 = vmax.f32 %v1632_v26, %v1259_v37  ;;  %v1728_v47 = vmax.f32 %v1634_v27, %v1258_v11  ;;  %v596_v17 = vld [vmem:[#allocation7 + $0x10] sm:$0xff]  ;;  %v614_v27 = vld [vmem:[#allocation7 + $0xa0] sm:$0xff]  ;;  %1134 = vmatprep.subr.bf16.mxu0 %v1133_v56  ;;  %v631_v35 = vld [vmem:[#allocation7 + $0x128] sm:$0xff] }
 0x1b9   :  { %1296 = vrot.lane.b32.xlu1 %v1295_v12, %s1488_s27  ;;  %1311 = vrot.lane.b32.xlu0 %v1310_v23, %s1488_s27  ;;  %v1135_v58 = vpack.c.bf16 %v597_v55, %v596_v17  ;;  %v1137_v2 = vpack.c.bf16 %v615_v57, %v614_v27  ;;  %v1169_v36 = vpack.c.bf16 %v631_v35, %v630_v19  ;;  %v602_v12 = vld [vmem:[#allocation7 + $0x40] sm:$0xff]  ;;  %v603_v23 = vld [vmem:[#allocation7 + $0x48] sm:$0xff]  ;;  %v624_v27 = vld [vmem:[#allocation7 + $0xf0] sm:$0xff] }
 0x1ba   :  { %v1320_v18 = vpack.i.bf16 %v1719_v42, %v1722_v43  ;;  %v1315_v26 = vpack.i.bf16 %v1725_v46, %v1728_v47  ;;  %1166 = vmatprep.subr.bf16.mxu1 %v1165_v6  ;;  %v1143_v37 = vpack.c.bf16 %v601_v5, %v600_v25  ;;  %v1145_v11 = vpack.c.bf16 %v619_v34, %v618_v31  ;;  %v625_v57 = vld [vmem:[#allocation7 + $0xf8] sm:$0xff]  ;;  %v636_v19 = vld [vmem:[#allocation7 + $0x150] sm:$0xff] }
 0x1bb   :  { %1136 = vmatpush3.bf16.msra.mxu0 %v1135_v58  ;;  %1168 = vmatpush3.bf16.msra.mxu1 %v1165_v6  ;;  %v1147_v24 = vpack.c.bf16 %v603_v23, %v602_v12  ;;  %v1151_v17 = vpack.c.bf16 %v605_v52, %v604_v49  ;;  %v1153_v55 = vpack.c.bf16 %v623_v54, %v622_v53  ;;  %v632_v58 = vld [vmem:[#allocation7 + $0x130] sm:$0xff]  ;;  %v637_v31 = vld [vmem:[#allocation7 + $0x158] sm:$0xff]  ;;  %v638_v12 = vld [vmem:[#allocation7 + $0x160] sm:$0xff] }
 0x1bc   :  { %1138 = vmatprep.subr.bf16.mxu0 %v1137_v2  ;;  %1170 = vmatprep.subr.bf16.mxu1 %v1169_v36  ;;  %v1157_v2 = vpack.c.bf16 %v625_v57, %v624_v27  ;;  %v1159_v7 = vpack.c.bf16 %v609_v3, %v608_v0  ;;  %v1173_v8 = vpack.c.bf16 %v633_v4, %v632_v58  ;;  %v639_v23 = vld [vmem:[#allocation7 + $0x168] sm:$0xff]  ;;  %v640_v53 = vld [vmem:[#allocation7 + $0x170] sm:$0xff]  ;;  %v641_v54 = vld [vmem:[#allocation7 + $0x178] sm:$0xff] }
 0x1bd   :  { %1321 = vrot.lane.b32.xlu1 %v1320_v18, %s1488_s27  ;;  %1316 = vrot.lane.b32.xlu0 %v1315_v26, %s1488_s27  ;;  %v606_v18 = vld [vmem:[#allocation7 + $0x60] sm:$0xff]  ;;  %v607_v26 = vld [vmem:[#allocation7 + $0x68] sm:$0xff] }
 0x1be   :  { %v1155_v56 = vpack.c.bf16 %v607_v26, %v606_v18  ;;  %v1189_v18 = vpack.c.bf16 %v641_v54, %v640_v53 }
 0x1bf   :  { %1140 = vmatpush3.bf16.msra.mxu0 %v1139_v16  ;;  %1172 = vmatpush3.bf16.msra.mxu1 %v1169_v36 }
 0x1c0   :  { %1142 = vmatprep.subr.bf16.mxu0 %v1141_v22  ;;  %1174 = vmatprep.subr.bf16.mxu1 %v1173_v8  ;;  %v1177_v22 = vpack.c.bf16 %v635_v15, %v634_v63 }
 0x1c3   :  { %1144 = vmatpush3.bf16.msra.mxu0 %v1143_v37  ;;  %1176 = vmatpush3.bf16.msra.mxu1 %v1173_v8  ;;  %v1181_v37 = vpack.c.bf16 %v637_v31, %v636_v19 }
 0x1c4   :  { %1146 = vmatprep.subr.bf16.mxu0 %v1145_v11  ;;  %1178 = vmatprep.subr.bf16.mxu1 %v1177_v22 }
 0x1c7   :  { %1148 = vmatpush3.bf16.msra.mxu0 %v1147_v24  ;;  %1180 = vmatpush3.bf16.msra.mxu1 %v1177_v22 }
 0x1c8   :  { %1150 = vmatprep.subr.bf16.mxu0 %v1149_v48  ;;  %1182 = vmatprep.subr.bf16.mxu1 %v1181_v37  ;;  %v1185_v48 = vpack.c.bf16 %v639_v23, %v638_v12 }
 0x1cb   :  { %1152 = vmatpush3.bf16.msra.mxu0 %v1151_v17  ;;  %1184 = vmatpush3.bf16.msra.mxu1 %v1181_v37 }
 0x1cc   :  { %1154 = vmatprep.subr.bf16.mxu0 %v1153_v55  ;;  %1186 = vmatprep.subr.bf16.mxu1 %v1185_v48 }
 0x1cf   :  { %1156 = vmatpush3.bf16.msra.mxu0 %v1155_v56  ;;  %1188 = vmatpush3.bf16.msra.mxu1 %v1185_v48 }
 0x1d0   :  { %1158 = vmatprep.subr.bf16.mxu0 %v1157_v2  ;;  %1190 = vmatprep.subr.bf16.mxu1 %v1189_v18 }
 0x1d3   :  { %1160 = vmatpush3.bf16.msra.mxu0 %v1159_v7  ;;  %1192 = vmatpush3.bf16.msra.mxu1 %v1189_v18 }
 0x212   :  { %v1267_v9 = vpop.permute.xlu0 %1266 }
 0x213   :  { %v1269_v16 = vunpack.i.h.bf16 %v1267_v9  ;;  %v1268_v20 = vunpack.i.l.bf16 %v1267_v9 }
 0x215   :  { %v1739_v25 = vmax.f32 %v1640_v32, %v1269_v16  ;;  %v1742_v5 = vmax.f32 %v1642_v33, %v1268_v20 }
 0x216   :  { %v1272_v6 = vpop.permute.xlu1 %1271 }
 0x217   :  { %v1274_v34 = vunpack.i.h.bf16 %v1272_v6  ;;  %v1273_v35 = vunpack.i.l.bf16 %v1272_v6  ;;  %v1325_v36 = vpack.i.bf16 %v1739_v25, %v1742_v5 }
 0x219   :  { %v1747_v11 = vmax.f32 %v1646_v38, %v1274_v34  ;;  %v1750_v32 = vmax.f32 %v1648_v39, %v1273_v35  ;;  %1326 = vrot.lane.b32.xlu0 %v1325_v36, %s1489_s28 }
 0x21a   :  { %v1277_v33 = vpop.permute.xlu0 %1276 }
 0x21b   :  { %v1279_v40 = vunpack.i.h.bf16 %v1277_v33  ;;  %v1278_v41 = vunpack.i.l.bf16 %v1277_v33  ;;  %v1330_v24 = vpack.i.bf16 %v1747_v11, %v1750_v32 }
 0x21d   :  { %v1756_v38 = vmax.f32 %v1653_v44, %v1279_v40  ;;  %v1759_v39 = vmax.f32 %v1655_v45, %v1278_v41  ;;  %1331 = vrot.lane.b32.xlu1 %v1330_v24, %s1489_s28 }
 0x21f   :  { %v1282_v49 = vpop.permute.xlu1 %1281  ;;  %v1335_v52 = vpack.i.bf16 %v1756_v38, %v1759_v39 }
 0x220   :  { %v1284_v17 = vunpack.i.h.bf16 %v1282_v49  ;;  %v1283_v55 = vunpack.i.l.bf16 %v1282_v49 }
 0x221   :  { %1336 = vrot.lane.b32.xlu0 %v1335_v52, %s1489_s28 }
 0x222   :  { %v1766_v44 = vmax.f32 %v1660_v50, %v1284_v17  ;;  %v1769_v45 = vmax.f32 %v1662_v51, %v1283_v55 }
 0x223   :  { %v1287_v26 = vpop.permute.xlu1 %1286  ;;  %v1302_v56 = vpop.permute.xlu0 %1301 }
 0x224   :  { %v1289_v27 = vunpack.i.h.bf16 %v1287_v26  ;;  %v1288_v57 = vunpack.i.l.bf16 %v1287_v26  ;;  %v1304_v58 = vunpack.i.h.bf16 %v1302_v56  ;;  %v1303_v2 = vunpack.i.l.bf16 %v1302_v56 }
 0x225   :  { %v1340_v0 = vpack.i.bf16 %v1766_v44, %v1769_v45 }
 0x226   :  { %v1774_v3 = vmax.f32 %v1668_v59, %v1289_v27  ;;  %v1777_v50 = vmax.f32 %v1671_v60, %v1288_v57  ;;  %v1780_v51 = vmax.f32 %v1673_v61, %v1304_v58  ;;  %v1783_v4 = vmax.f32 %v1675_v62, %v1303_v2 }
 0x227   :  { %1341 = vrot.lane.b32.xlu1 %v1340_v0, %s1489_s28  ;;  %v1292_v7 = vpop.permute.xlu1 %1291  ;;  %v1307_v8 = vpop.permute.xlu0 %1306 }
 0x228   :  { %v1294_v9 = vunpack.i.h.bf16 %v1292_v7  ;;  %v1293_v63 = vunpack.i.l.bf16 %v1292_v7  ;;  %v1309_v15 = vunpack.i.h.bf16 %v1307_v8  ;;  %v1308_v16 = vunpack.i.l.bf16 %v1307_v8 }
 0x229   :  { %v1345_v59 = vpack.i.bf16 %v1774_v3, %v1777_v50  ;;  %v1360_v60 = vpack.i.bf16 %v1780_v51, %v1783_v4 }
 0x22a   :  { %v1791_v61 = vmax.f32 %v1683_v1, %v1294_v9  ;;  %v1794_v62 = vmax.f32 %v1686_v10, %v1293_v63  ;;  %v1797_v20 = vmax.f32 %v1689_v13, %v1309_v15  ;;  %v1800_v22 = vmax.f32 %v1692_v14, %v1308_v16 }
 0x22b   :  { %1346 = vrot.lane.b32.xlu1 %v1345_v59, %s1489_s28  ;;  %1361 = vrot.lane.b32.xlu0 %v1360_v60, %s1489_s28  ;;  %v1297_v6 = vpop.permute.xlu1 %1296  ;;  %v1312_v19 = vpop.permute.xlu0 %1311 }
 0x22c   :  { %v1299_v31 = vunpack.i.h.bf16 %v1297_v6  ;;  %v1298_v34 = vunpack.i.l.bf16 %v1297_v6  ;;  %v1314_v35 = vunpack.i.h.bf16 %v1312_v19  ;;  %v1313_v1 = vunpack.i.l.bf16 %v1312_v19 }
 0x22d   :  { %v1350_v10 = vpack.i.bf16 %v1791_v61, %v1794_v62  ;;  %v1365_v13 = vpack.i.bf16 %v1797_v20, %v1800_v22 }
 0x22e   :  { %v1809_v36 = vmax.f32 %v1701_v28, %v1299_v31  ;;  %v1812_v14 = vmax.f32 %v1704_v21, %v1298_v34  ;;  %v1815_v37 = vmax.f32 %v1707_v29, %v1314_v35  ;;  %v1818_v33 = vmax.f32 %v1710_v30, %v1313_v1 }
 0x22f   :  { %1351 = vrot.lane.b32.xlu1 %v1350_v10, %s1489_s28  ;;  %1366 = vrot.lane.b32.xlu0 %v1365_v13, %s1489_s28  ;;  %v1322_v12 = vpop.permute.xlu1 %1321  ;;  %v1317_v23 = vpop.permute.xlu0 %1316 }
 0x230   :  { %v1324_v40 = vunpack.i.h.bf16 %v1322_v12  ;;  %v1323_v41 = vunpack.i.l.bf16 %v1322_v12  ;;  %v1319_v24 = vunpack.i.h.bf16 %v1317_v23  ;;  %v1318_v28 = vunpack.i.l.bf16 %v1317_v23 }
 0x231   :  { %v1355_v21 = vpack.i.bf16 %v1809_v36, %v1812_v14  ;;  %v1370_v29 = vpack.i.bf16 %v1815_v37, %v1818_v33 }
 0x232   :  { %v1827_v48 = vmax.f32 %v1719_v42, %v1324_v40  ;;  %v1830_v30 = vmax.f32 %v1722_v43, %v1323_v41  ;;  %v1833_v49 = vmax.f32 %v1725_v46, %v1319_v24  ;;  %v1836_v52 = vmax.f32 %v1728_v47, %v1318_v28 }
 0x233   :  { %1356 = vrot.lane.b32.xlu1 %v1355_v21, %s1489_s28  ;;  %1371 = vrot.lane.b32.xlu0 %v1370_v29, %s1489_s28 }
 0x234   :  { %v1380_v53 = vpack.i.bf16 %v1827_v48, %v1830_v30  ;;  %v1375_v42 = vpack.i.bf16 %v1833_v49, %v1836_v52 }
 0x237   :  { %1381 = vrot.lane.b32.xlu1 %v1380_v53, %s1489_s28  ;;  %1376 = vrot.lane.b32.xlu0 %v1375_v42, %s1489_s28 }
 0x28b   :  { %v1327_v43 = vpop.permute.xlu0 %1326 }
 0x28c   :  { %v1329_v46 = vunpack.i.h.bf16 %v1327_v43  ;;  %v1328_v54 = vunpack.i.l.bf16 %v1327_v43 }
 0x28e   :  { %v417_v47 = vmax.f32 %v1739_v25, %v1329_v46  ;;  %v497_v17 = vmax.f32 %v1742_v5, %v1328_v54 }
 0x28f   :  { %v1332_v55 = vpop.permute.xlu1 %1331 }
 0x290   :  { %v425_v18 = vmax.f32 %v417_v47, 0.0  ;;  %v1334_v26 = vunpack.i.h.bf16 %v1332_v55  ;;  %v1333_v56 = vunpack.i.l.bf16 %v1332_v55  ;;  %v505_v27 = vmax.f32 %v497_v17, 0.0 }
 0x292   :  { %v418_v57 = vmax.f32 %v1747_v11, %v1334_v26  ;;  %v498_v58 = vmax.f32 %v1750_v32, %v1333_v56  ;;  %706 = vmatprep.mubr.f32.mxu0 %v505_v27 }
 0x293   :  { %v1337_v2 = vpop.permute.xlu0 %1336  ;;  %707 = vmatmul.mubr.f32.vlgmr.msra.gmra.mrb[16].mxu0 %v425_v18 }
 0x294   :  { %v1339_v0 = vunpack.i.h.bf16 %v1337_v2  ;;  %v1338_v7 = vunpack.i.l.bf16 %v1337_v2  ;;  %v506_v8 = vmax.f32 %v498_v58, 0.0  ;;  %v426_v9 = vmax.f32 %v418_v57, 0.0 }
 0x296   :  { %v419_v25 = vmax.f32 %v1756_v38, %v1339_v0  ;;  %v499_v5 = vmax.f32 %v1759_v39, %v1338_v7  ;;  %711 = vmatprep.mubr.f32.mxu0 %v506_v8 }
 0x297   :  { %712 = vmatmul.mubr.f32.gmra.mrb[18].mxu0 %v426_v9 }
 0x298   :  { %v507_v63 = vmax.f32 %v499_v5, 0.0  ;;  %v427_v15 = vmax.f32 %v419_v25, 0.0 }
 0x299   :  { %v1342_v16 = vpop.permute.xlu1 %1341 }
 0x29a   :  { %v1344_v59 = vunpack.i.h.bf16 %v1342_v16  ;;  %v1343_v11 = vunpack.i.l.bf16 %v1342_v16  ;;  %716 = vmatprep.mubr.f32.mxu0 %v507_v63 }
 0x29b   :  { %717 = vmatmul.mubr.f32.gmra.mrb[20].mxu0 %v427_v15 }
 0x29c   :  { %v420_v32 = vmax.f32 %v1766_v44, %v1344_v59  ;;  %v500_v60 = vmax.f32 %v1769_v45, %v1343_v11 }
 0x29d   :  { %v1347_v6 = vpop.permute.xlu1 %1346  ;;  %v1362_v19 = vpop.permute.xlu0 %1361 }
 0x29e   :  { %v1349_v31 = vunpack.i.h.bf16 %v1347_v6  ;;  %v1348_v34 = vunpack.i.l.bf16 %v1347_v6  ;;  %v1364_v38 = vunpack.i.h.bf16 %v1362_v19  ;;  %v1363_v35 = vunpack.i.l.bf16 %v1362_v19 }
 0x29f   :  { %v508_v39 = vmax.f32 %v500_v60, 0.0  ;;  %v428_v1 = vmax.f32 %v420_v32, 0.0 }
 0x2a0   :  { %v578_v10 = vmax.f32 %v1774_v3, %v1349_v31  ;;  %v577_v13 = vmax.f32 %v1777_v50, %v1348_v34  ;;  %v421_v12 = vmax.f32 %v1780_v51, %v1364_v38  ;;  %v501_v23 = vmax.f32 %v1783_v4, %v1363_v35 }
 0x2a1   :  { %721 = vmatprep.mubr.f32.mxu0 %v508_v39  ;;  %v1352_v44 = vpop.permute.xlu1 %1351  ;;  %v1367_v40 = vpop.permute.xlu0 %1366 }
 0x2a2   :  { %v586_v45 = vmax.f32 %v578_v10, 0.0  ;;  %v1354_v41 = vunpack.i.h.bf16 %v1352_v44  ;;  %v1353_v24 = vunpack.i.l.bf16 %v1352_v44  ;;  %v1369_v28 = vunpack.i.h.bf16 %v1367_v40  ;;  %722 = vmatmul.mubr.f32.gmra.mrb[22].mxu0 %v428_v1  ;;  %v911_v1 = vld [vmem:[%s1891_s3] ss:$0 sm:$0xff]  ;;  %s1490_s3 = smov [#allocation8]  }
 0x2a3   :  { %v1368_v21 = vunpack.i.l.bf16 %v1367_v40  ;;  %v509_v29 = vmax.f32 %v501_v23, 0.0  ;;  %v585_v53 = vmax.f32 %v577_v13, 0.0  ;;  %v429_v42 = vmax.f32 %v421_v12, 0.0  ;;  %s879_s5 = sshll.u32 %s1490_s3, 4  ;;  %s880_s5 = int_to_ptr.vmem [resolvable:$true] %s879_s5 }
 0x2a4   :  { %v580_v3 = vmax.f32 %v1791_v61, %v1354_v41  ;;  %v579_v50 = vmax.f32 %v1794_v62, %v1353_v24  ;;  %v422_v51 = vmax.f32 %v1797_v20, %v1369_v28  ;;  %s1451_s6 = scalar_lea.vmem %s880_s5, 1024  ;;  %p1456_p11 = scmp.lt.s32.totalorder %s880_s5, %s880_s5 }
 0x2a5   :  { %v502_v4 = vmax.f32 %v1800_v22, %v1368_v21  ;;  %726 = vmatprep.mubr.f32.mxu0 %v509_v29  ;;  %1077 = vmatprep.mubr.f32.mxu1 %v585_v53  ;;  %v1357_v43 = vpop.permute.xlu1 %1356  ;;  %v1372_v46 = vpop.permute.xlu0 %1371  ;;  %p1452_p10 = scmp.ne.s32.totalorder %s880_s5, %s1451_s6  ;;  %p1457_p12 = scmp.lt.s32.totalorder %s1451_s6, %s1451_s6 }
 0x2a6   :  { %v1359_v54 = vunpack.i.h.bf16 %v1357_v43  ;;  %v1358_v47 = vunpack.i.l.bf16 %v1357_v43  ;;  %1078 = vmatmul.mubr.f32.vlgmr.msra.gmra.mrb[8].mxu1 %v586_v45  ;;  %v1374_v17 = vunpack.i.h.bf16 %v1372_v46  ;;  %v1373_v55 = vunpack.i.l.bf16 %v1372_v46  ;;  %727 = vmatmul.mubr.f32.gmra.mrb[24].mxu0 %v429_v42 }
 0x2a7   :  { %v510_v18 = vmax.f32 %v502_v4, 0.0  ;;  %v587_v26 = vmax.f32 %v579_v50, 0.0  ;;  %v430_v56 = vmax.f32 %v422_v51, 0.0  ;;  %v588_v61 = vmax.f32 %v580_v3, 0.0  ;;  %p1458_p13 = por %p1457_p12, %p1456_p11 }
 0x2a8   :  { %v582_v62 = vmax.f32 %v1809_v36, %v1359_v54  ;;  %v581_v20 = vmax.f32 %v1812_v14, %v1358_v47  ;;  %v423_v22 = vmax.f32 %v1815_v37, %v1374_v17  ;;  %v503_v27 = vmax.f32 %v1818_v33, %v1373_v55 }
 0x2a9   :  { %731 = vmatprep.mubr.f32.mxu0 %v510_v18  ;;  %1080 = vmatprep.mubr.f32.mxu1 %v587_v26  ;;  %v1382_v57 = vpop.permute.xlu1 %1381  ;;  %v1377_v58 = vpop.permute.xlu0 %1376  ;;  %p1459_p0 = pnand %p1458_p13, %p1452_p10 }
 0x2aa   :  { %v1384_v2 = vunpack.i.h.bf16 %v1382_v57  ;;  %v1383_v0 = vunpack.i.l.bf16 %v1382_v57  ;;  %732 = vmatmul.mubr.f32.gmra.mrb[26].mxu0 %v430_v56  ;;  %1081 = vmatmul.mubr.f32.gmra.mrb[10].mxu1 %v588_v61  ;;  %v1379_v7 = vunpack.i.h.bf16 %v1377_v58  ;;  %v1378_v8 = vunpack.i.l.bf16 %v1377_v58 }
 0x2ab   :  { %v511_v9 = vmax.f32 %v503_v27, 0.0  ;;  %v589_v25 = vmax.f32 %v581_v20, 0.0  ;;  %v431_v5 = vmax.f32 %v423_v22, 0.0  ;;  %v590_v36 = vmax.f32 %v582_v62, 0.0 }
 0x2ac   :  { %v584_v14 = vmax.f32 %v1827_v48, %v1384_v2  ;;  %v583_v37 = vmax.f32 %v1830_v30, %v1383_v0  ;;  %v424_v33 = vmax.f32 %v1833_v49, %v1379_v7  ;;  %v504_v63 = vmax.f32 %v1836_v52, %v1378_v8 }
 0x2ad   :  { %736 = vmatprep.mubr.f32.mxu0 %v511_v9  ;;  %1083 = vmatprep.mubr.f32.mxu1 %v589_v25 }
 0x2ae   :  { %v592_v15 = vmax.f32 %v584_v14, 0.0  ;;  %v591_v16 = vmax.f32 %v583_v37, 0.0  ;;  %v432_v59 = vmax.f32 %v424_v33, 0.0  ;;  %v512_v11 = vmax.f32 %v504_v63, 0.0  ;;  %737 = vmatmul.mubr.f32.gmra.mrb[28].mxu0 %v431_v5  ;;  %1084 = vmatmul.mubr.f32.gmra.mrb[12].mxu1 %v590_v36 }
 0x2b0   :  { %741 = vmatprep.mubr.f32.mxu0 %v512_v11  ;;  %1086 = vmatprep.mubr.f32.mxu1 %v591_v16 }
 0x2b2   :  { %742 = vmatmul.mubr.f32.gmra.mrb[30].mxu0 %v432_v59  ;;  %1087 = vmatmul.mubr.f32.gmra.mrb[14].mxu1 %v592_v15 }
 0x366   :  { %v963_v32 = vpop.f32.mrb[16].mxu0 }
 0x367   :  { %v964_v48 = vpop.f32.mrb[17].mxu0 }
 0x368   :  { %v965_v60 = vadd.f32 %v964_v48, %v963_v32 }
 0x36a   :  { %v966_v30 = vpop.f32.mrb[18].mxu0 }
 0x36b   :  { %v967_v6 = vpop.f32.mrb[19].mxu0 }
 0x36c   :  { %v968_v49 = vadd.f32 %v967_v6, %v966_v30 }
 0x36e   :  { %v969_v19 = vpop.f32.mrb[20].mxu0 }
 0x36f   :  { %v970_v52 = vpop.f32.mrb[21].mxu0 }
 0x370   :  { %v971_v31 = vadd.f32 %v970_v52, %v969_v19 }
 0x375   :  { %v972_v34 = vpop.f32.mrb[22].mxu0 }
 0x376   :  { %v973_v38 = vpop.f32.mrb[23].mxu0 }
 0x377   :  { %v974_v35 = vadd.f32 %v973_v38, %v972_v34 }
 0x379   :  { %v975_v39 = vpop.f32.mrb[24].mxu0  ;;  %v1079_v10 = vpop.f32.mrb[8].mxu1 }
 0x37a   :  { %v819_v13 = vadd.f32 %v1079_v10, %v968_v49  ;;  %v976_v12 = vpop.f32.mrb[25].mxu0  ;;  %v813_v23 = vpop.f32.mrb[9].mxu1 }
 0x37b   :  { %v977_v44 = vadd.f32 %v976_v12, %v975_v39  ;;  %v814_v40 = vadd.f32 %v965_v60, %v813_v23 }
 0x37c   :  { %v859_v45 = vadd.f32 %v911_v1, %v819_v13 }
 0x37d   :  { %v858_v41 = vadd.f32 %v911_v1, %v814_v40  ;;  %v978_v24 = vpop.f32.mrb[26].mxu0  ;;  %v1082_v28 = vpop.f32.mrb[10].mxu1 }
 0x37e   :  { %867 = vst [vmem:[#allocation8 + $0x8] sm:$0xff] %v859_v45  ;;  %v829_v21 = vadd.f32 %v1082_v28, %v974_v35  ;;  %v979_v29 = vpop.f32.mrb[27].mxu0  ;;  %v823_v53 = vpop.f32.mrb[11].mxu1 }
 0x37f   :  { %866 = vst [vmem:[#allocation8] sm:$0xff] %v858_v41  ;;  %v980_v42 = vadd.f32 %v979_v29, %v978_v24  ;;  %v824_v3 = vadd.f32 %v971_v31, %v823_v53 }
 0x380   :  { %v861_v50 = vadd.f32 %v911_v1, %v829_v21 }
 0x381   :  { %v860_v51 = vadd.f32 %v911_v1, %v824_v3  ;;  %v981_v4 = vpop.f32.mrb[28].mxu0  ;;  %v1085_v43 = vpop.f32.mrb[12].mxu1 }
 0x382   :  { %869 = vst [vmem:[#allocation8 + $0x18] sm:$0xff] %v861_v50  ;;  %v839_v46 = vadd.f32 %v1085_v43, %v980_v42  ;;  %v982_v54 = vpop.f32.mrb[29].mxu0  ;;  %v833_v47 = vpop.f32.mrb[13].mxu1 }
 0x383   :  { %868 = vst [vmem:[#allocation8 + $0x10] sm:$0xff] %v860_v51  ;;  %v983_v17 = vadd.f32 %v982_v54, %v981_v4  ;;  %v834_v55 = vadd.f32 %v977_v44, %v833_v47 }
 0x384   :  { %v863_v18 = vadd.f32 %v911_v1, %v839_v46 }
 0x385   :  { %v862_v26 = vadd.f32 %v911_v1, %v834_v55  ;;  %v984_v56 = vpop.f32.mrb[30].mxu0  ;;  %v1088_v61 = vpop.f32.mrb[14].mxu1 }
 0x386   :  { %871 = vst [vmem:[#allocation8 + $0x28] sm:$0xff] %v863_v18  ;;  %v985_v62 = vpop.f32.mrb[31].mxu0  ;;  %v843_v20 = vpop.f32.mrb[15].mxu1 }
 0x387   :  { %870 = vst [vmem:[#allocation8 + $0x20] sm:$0xff] %v862_v26  ;;  %v986_v22 = vadd.f32 %v985_v62, %v984_v56  ;;  %v844_v27 = vadd.f32 %v983_v17, %v843_v20 }
 0x389   :  { %v849_v57 = vadd.f32 %v1088_v61, %v986_v22  ;;  %v864_v58 = vadd.f32 %v911_v1, %v844_v27 }
 0x38b   :  { %v865_v2 = vadd.f32 %v911_v1, %v849_v57  ;;  %872 = vst [vmem:[#allocation8 + $0x30] sm:$0xff] %v864_v58 }
 0x38d   :  { %873 = vst [vmem:[#allocation8 + $0x38] sm:$0xff] %v865_v2 }
 0x38e   :  { %1462 = shalt.err (!%p1459_p0)
}
 0x38f   :  { %s1463_s9 = scalar_lea.hbm %s1892_s4, 1024 }
 0x390   :  { %p1464_p1 = scmp.ne.s32.totalorder %s1892_s4, %s1463_s9  ;;  %p1467_p2 = scmp.lt.u32.totalorder %s1463_s9, %s1892_s4 }
 0x392   :  { %p1469_p3 = pnand %p1467_p2, %p1464_p1 }
 0x394   :  { %1472 = shalt.err (!%p1469_p3)
}
 0x395   :  { %885 = dma.vmem_to_hbm [thread:$0]  %s880_s5, 1024, %s1892_s4, [#allocation4], %s1483_s1, %s1483_s1, %s1484_s13  }
 0x396   :  { %1477 = dma.done.wait [#allocation4], 1024  }
 0x397   :  { %1478 = vsyncadd [#allocation4], 4294966272 }
 0x398   :  { %889 = vsyncpa [#allocation3], 1 }
 0x399   :  { %890 = vsyncpa [#allocation6], 1 }
 0x39a   :  { %891 = vsyncpa [#allocation4], 1 }

</bundles_post_ra>
